<compile_context>
chip_gen: v5e
topology: v5e:2x2
jax: 0.10.0
libtpu: 0.0.40
codegen_flags: <defaults>
</compile_context>

<pallas_src>
import functools

import jax
import jax.numpy as jnp
import numpy as np
from jax.experimental import pallas as pl
from jax.experimental.pallas import tpu as pltpu


def _round_up(n, m):
    return ((n + m - 1) // m) * m


def _default_act_dtype():
    """bf16 activations only where the EUP/VPU are bf16-capable (v6e / v7x)."""
    try:
        kind = jax.devices()[0].device_kind.lower()
    except Exception:  # pragma: no cover - be conservative
        return jnp.float32
    return jnp.bfloat16 if ("v6" in kind or "v7" in kind) else jnp.float32


def qnn_kernel(x_ref, w1_ref, b1_ref, w2_ref, b2_ref, y_ref, *, kp, mm_dtype,
               act_dtype):
    """Feature-major QNN forward for one batch tile.

    x_ref : (TB, J)           batch-major input tile (f32, as stored in HBM)
    w1_ref: (F1P, J)          fused [mc | 0.5*lc1 | sc1] weights (sigmoid's 0.5
                              pre-scale folded into lc1), row blocks padded x8
    b1_ref: (F1P, 1)          fused first-layer bias (f32, lc1 part pre-scaled)
    w2_ref: (2*KP, KKP+KSP)   block-diagonal [[0.25*lc2, 0], [0, sc2]]
    b2_ref: (2*KP, 1)         [0.5*blc2 + 0.25*sum(wlc2) ; bsc2]
    y_ref : (KP, TB)          output tile (rows >= K are padding)
    """
    # Batch-major -> feature-major: batch lands on the 128-lane axis; the small
    # (TB, J) -> (J, TB) transpose runs on the otherwise idle XLU slot.
    xT = x_ref[...].T.astype(mm_dtype)                                # (J, TB)

    # Fused first layer: one MXU push for mc / lc1 / sc1 (shared J contraction),
    # f32 accumulation, f32 bias add.
    h1 = jnp.dot(w1_ref[...], xT,
                 preferred_element_type=jnp.float32) + b1_ref[...]    # (F1P, TB)

    m = jnp.maximum(h1[:kp, :], 0.0)                                  # relu(mc(x))

    # Single tanh over BOTH the lc1 branch (sigmoid folded into weights via
    # sigmoid(z)=0.5*tanh(0.5 z)+0.5) and the sc1 branch — the bulk of the EUP
    # work; bf16 on v6e/v7x, f32 on v5e.
    t1 = jnp.tanh(h1[kp:, :].astype(act_dtype))                       # (KKP+KSP, TB)

    # Fused block-diagonal second layer (0.25*lc2 | sc2), then one tanh:
    #   rows [:kp)  -> tl, with l = 0.5*tl + 0.5 (sigmoid identity, scales folded)
    #   rows [kp:)  -> s  = tanh(sc2(tanh(sc1(x))))
    t2 = jnp.tanh(jnp.dot(w2_ref[...], t1.astype(mm_dtype),
                          preferred_element_type=jnp.float32) + b2_ref[...])
    tl = t2[:kp, :]
    s = t2[kp:, :]

    # y = sigmoid(l*m + (1-l)*s) with l = 0.5*tl + 0.5:
    #   l*m + (1-l)*s = 0.5*(m + s + tl*(m - s))
    #   sigmoid(u)    = 0.5*tanh(0.5*u) + 0.5          (kept in f32)
    y_ref[...] = 0.5 * jnp.tanh(0.25 * (m + s + tl * (m - s))) + 0.5


def _pick_batch_tile(B, tb_req):
    """Lane-aligned batch tile; keep >=2 grid steps for v7x megacore when the
    batch allows, maximize otherwise."""
    if B <= 256:
        return _round_up(B, 8)                    # single block == whole batch
    half = ((B // 2) // 128) * 128                # leave at least 2 grid steps
    tb = (max(128, tb_req) // 128) * 128
    return max(128, min(tb, half))


def qnn_forward(x, params, *, tb=2048, matmul_dtype=jnp.bfloat16, act_dtype=None):
    """x: (B, J) float32; params: dict of (in,out) weights and (1,out) biases.

    Returns (B, K) float32, matching the PyTorch QNN.forward.
    """
    B, J = x.shape
    K = params["wmc"].shape[1]
    Kstar = params["wsc1"].shape[1]
    KK = K + Kstar
    assert params["wlc1"].shape[1] == KK and params["wlc2"].shape[0] == KK
    if act_dtype is None:
        act_dtype = _default_act_dtype()

    # Sublane-aligned branch widths inside the fused layers.
    kp, kkp, ksp = _round_up(K, 8), _round_up(KK, 8), _round_up(Kstar, 8)
    f1p = kp + kkp + ksp

    def padT(w, rows, cols, scale=1.0):
        wt = (scale * jnp.asarray(w, jnp.float32)).T                # (out, in)
        return (jnp.zeros((rows, cols), jnp.float32)
                .at[:wt.shape[0], :wt.shape[1]].set(wt))

    def padb(b, rows, scale=1.0, extra=None):
        bt = scale * jnp.asarray(b, jnp.float32).reshape(-1)
        if extra is not None:
            bt = bt + extra
        return jnp.zeros((rows,), jnp.float32).at[:bt.shape[0]].set(bt)

    # --- sigmoid -> tanh identity folded into the (tiny) weights -------------
    # lc1: sigmoid(z) = 0.5*tanh(0.5*z)+0.5  ->  scale Wlc1, blc1 by 0.5.
    # lc2: z2 = Wlc2^T l1 + blc2 = 0.5*Wlc2^T t1 + (blc2 + 0.5*sum_in(Wlc2));
    #      outer sigmoid scales again by 0.5 -> 0.25*Wlc2^T, 0.5*blc2 + 0.25*sum.
    w1 = jnp.concatenate([padT(params["wmc"], kp, J),
                          padT(params["wlc1"], kkp, J, scale=0.5),
                          padT(params["wsc1"], ksp, J)], axis=0).astype(matmul_dtype)
    b1 = jnp.concatenate([padb(params["bmc"], kp),
                          padb(params["blc1"], kkp, scale=0.5),
                          padb(params["bsc1"], ksp)]).reshape(f1p, 1)

    w2 = jnp.zeros((2 * kp, kkp + ksp), jnp.float32)
    w2 = w2.at[:kp, :kkp].set(padT(params["wlc2"], kp, kkp, scale=0.25))
    w2 = w2.at[kp:, kkp:].set(padT(params["wsc2"], kp, ksp))
    w2 = w2.astype(matmul_dtype)
    b2 = jnp.concatenate([
        padb(params["blc2"], kp, scale=0.5,
             extra=0.25 * jnp.asarray(params["wlc2"], jnp.float32).sum(axis=0)),
        padb(params["bsc2"], kp)]).reshape(2 * kp, 1)

    # --- batch tiling: lane-dense, large tiles, >=2 steps for v7x megacore ---
    tb_eff = _pick_batch_tile(B, tb)
    n_blk = -(-B // tb_eff)
    B_pad = n_blk * tb_eff
    xb = x.astype(jnp.float32)
    if B_pad != B:                       # only pad when ragged (no transpose/cast pass)
        xb = jnp.pad(xb, ((0, B_pad - B), (0, 0)))

    itemsize = np.dtype(matmul_dtype).itemsize
    mm_flops = 2 * B_pad * (f1p * J + 2 * kp * (kkp + ksp))
    cost = pl.CostEstimate(
        flops=mm_flops + 12 * B_pad * kp,
        transcendentals=B_pad * ((kkp + ksp) + 2 * kp + kp),
        bytes_accessed=B_pad * J * 4 + kp * B_pad * 4
                       + (f1p * J + 2 * kp * (kkp + ksp)) * itemsize
                       + (f1p + 2 * kp) * 4)

    def full_spec(a):
        # Whole (small) parameter resident in VMEM for every grid step.
        # TODO(synk): K* = 2**K - K - 1 grows exponentially; for large K tile
        # the KK/K* axis with an "arbitrary" grid dim and set vmem_limit_bytes
        # (whole-weights-resident breaks around K~19 on v7x's 64 MiB VMEM).
        return pl.BlockSpec(a.shape, lambda i: (0, 0))

    yT = pl.pallas_call(
        functools.partial(qnn_kernel, kp=kp, mm_dtype=matmul_dtype,
                          act_dtype=act_dtype),
        out_shape=jax.ShapeDtypeStruct((kp, B_pad), jnp.float32),
        grid_spec=pl.GridSpec(
            grid=(n_blk,),
            in_specs=[pl.BlockSpec((tb_eff, J), lambda i: (i, 0)),
                      full_spec(w1), full_spec(b1),
                      full_spec(w2), full_spec(b2)],
            out_specs=pl.BlockSpec((kp, tb_eff), lambda i: (0, i)),
        ),
        compiler_params=pltpu.CompilerParams(
            dimension_semantics=("parallel",)),
        cost_estimate=cost,
    )(xb, w1, b1, w2, b2)

    return yT[:K, :B].T                                              # (B, K) f32


def qnn_reference(x, p):
    """Pure-JAX f32 reference with exact PyTorch QNN.forward semantics."""
    def dot(a, w):
        return jnp.dot(a, w, preferred_element_type=jnp.float32)

    m = jnp.maximum(dot(x, p["wmc"]) + p["bmc"], 0.0)
    l = jax.nn.sigmoid(dot(x, p["wlc1"]) + p["blc1"])
    l = jax.nn.sigmoid(dot(l, p["wlc2"]) + p["blc2"])
    s = jnp.tanh(dot(x, p["wsc1"]) + p["bsc1"])
    s = jnp.tanh(dot(s, p["wsc2"]) + p["bsc2"])
    return jax.nn.sigmoid(l * m + (1.0 - l) * s)


def init_params(key, J, K):
    """torch.nn.Linear-equivalent params: (in,out) weights, (1,out) biases."""
    Kstar = 2 ** K - K - 1           # interaction-only polynomial features of q
    KK = K + Kstar
    dims = {
        "mc":  (J, K),
        "lc1": (J, KK),
        "lc2": (KK, K),
        "sc1": (J, Kstar),
        "sc2": (Kstar, K),
    }
    params = {}
    keys = jax.random.split(key, 2 * len(dims))
    for i, (name, (din, dout)) in enumerate(dims.items()):
        bound = 1.0 / float(np.sqrt(din))   # torch default uniform init range
        params["w" + name] = jax.random.uniform(
            keys[2 * i], (din, dout), jnp.float32, -bound, bound)
        params["b" + name] = jax.random.uniform(
            keys[2 * i + 1], (1, dout), jnp.float32, -bound, bound)
    return params


if __name__ == "__main__":
    # J=16 items, K=4 skills -> K*=11, K+K*=15.
    J, K = 16, 4
    key = jax.random.PRNGKey(0)
    kparam, kx1, kx2 = jax.random.split(key, 3)
    params = init_params(kparam, J, K)

    # B=32 exercises the tiny single-block path; B=400 exercises the multi-block
    # (megacore-friendly) grid plus ragged batch padding.
    for B, kx in ((32, kx1), (400, kx2)):
        x = (jax.random.uniform(kx, (B, J)) > 0.5).astype(jnp.float32)
        ref = qnn_reference(x, params)

        # f32 operands + f32 activations: exact PyTorch-f32 semantics.
        y_exact = jax.block_until_ready(
            qnn_forward(x, params, matmul_dtype=jnp.float32, act_dtype=jnp.float32))
        # Default fast path: bf16 MXU operands (+ bf16 bulk activations on v6e/v7x).
        y_fast = jax.block_until_ready(qnn_forward(x, params))

        assert y_exact.shape == (B, K) and y_fast.shape == (B, K)
        assert jnp.allclose(y_exact, ref, atol=5e-5, rtol=5e-5), \
            float(jnp.abs(y_exact - ref).max())
        assert jnp.allclose(y_fast, ref, atol=3e-2), \
            float(jnp.abs(y_fast - ref).max())
    print("KERNEL_OK")
</pallas_src>

<mosaic_0001>
module attributes {stable_mosaic.version = 11 : i64} {
  func.func @qnn_kernel(%arg0: i32, %arg1: memref<32x16xf32, #tpu.memory_space<vmem>>, %arg2: memref<40x16xf32, #tpu.memory_space<vmem>>, %arg3: memref<40x1xf32, #tpu.memory_space<vmem>>, %arg4: memref<16x32xf32, #tpu.memory_space<vmem>>, %arg5: memref<16x1xf32, #tpu.memory_space<vmem>>, %arg6: memref<8x32xf32, #tpu.memory_space<vmem>>) attributes {dimension_semantics = [#tpu.dimension_semantics<parallel>], iteration_bounds = array<i64: 1>, scalar_prefetch = 0 : i64, scratch_operands = 0 : i64, tpu.core_type = #tpu.core_type<tc>, window_params = [{transform_indices = @transform_0, window_bounds = array<i64: 32, 16>}, {pipeline_mode = #tpu.pipeline_mode<synchronous>, transform_indices = @transform_1, window_bounds = array<i64: 40, 16>}, {pipeline_mode = #tpu.pipeline_mode<synchronous>, transform_indices = @transform_2, window_bounds = array<i64: 40, 1>}, {pipeline_mode = #tpu.pipeline_mode<synchronous>, transform_indices = @transform_3, window_bounds = array<i64: 16, 32>}, {pipeline_mode = #tpu.pipeline_mode<synchronous>, transform_indices = @transform_4, window_bounds = array<i64: 16, 1>}, {transform_indices = @transform_5, window_bounds = array<i64: 8, 32>}]} {
    %c0 = arith.constant 0 : index
    %c0_0 = arith.constant 0 : index
    %0 = vector.load %arg1[%c0, %c0_0] : memref<32x16xf32, #tpu.memory_space<vmem>>, vector<32x16xf32>
    %1 = tpu.transpose %0, [1, 0] : vector<32x16xf32> -> vector<16x32xf32>
    %c0_1 = arith.constant 0 : index
    %c0_2 = arith.constant 0 : index
    %2 = vector.load %arg2[%c0_1, %c0_2] : memref<40x16xf32, #tpu.memory_space<vmem>>, vector<40x16xf32>
    %cst = arith.constant dense<0.000000e+00> : vector<40x32xf32>
    %3 = tpu.matmul %2, %1, %cst {dimension_numbers = #tpu.dot_dimension_numbers<[1], [0], [0], [1], [0, 0, 1, 1], [], []>} : vector<40x16xf32>, vector<16x32xf32>, vector<40x32xf32> -> vector<40x32xf32>
    %c0_3 = arith.constant 0 : index
    %c0_4 = arith.constant 0 : index
    %4 = vector.load %arg3[%c0_3, %c0_4] : memref<40x1xf32, #tpu.memory_space<vmem>>, vector<40x1xf32>
    %5 = vector.broadcast %4 : vector<40x1xf32> to vector<40x32xf32>
    %6 = arith.addf %3, %5 : vector<40x32xf32>
    %7 = vector.extract_strided_slice %6 {offsets = [0, 0], sizes = [8, 32], strides = [1, 1]} : vector<40x32xf32> to vector<8x32xf32>
    %cst_5 = arith.constant 0.000000e+00 : f32
    %8 = vector.broadcast %cst_5 : f32 to vector<8x32xf32>
    %9 = arith.maximumf %7, %8 : vector<8x32xf32>
    %10 = vector.extract_strided_slice %6 {offsets = [8, 0], sizes = [32, 32], strides = [1, 1]} : vector<40x32xf32> to vector<32x32xf32>
    %11 = math.tanh %10 : vector<32x32xf32>
    %c0_6 = arith.constant 0 : index
    %c0_7 = arith.constant 0 : index
    %12 = vector.load %arg4[%c0_6, %c0_7] : memref<16x32xf32, #tpu.memory_space<vmem>>, vector<16x32xf32>
    %cst_8 = arith.constant dense<0.000000e+00> : vector<16x32xf32>
    %13 = tpu.matmul %12, %11, %cst_8 {dimension_numbers = #tpu.dot_dimension_numbers<[1], [0], [0], [1], [0, 0, 1, 1], [], []>} : vector<16x32xf32>, vector<32x32xf32>, vector<16x32xf32> -> vector<16x32xf32>
    %c0_9 = arith.constant 0 : index
    %c0_10 = arith.constant 0 : index
    %14 = vector.load %arg5[%c0_9, %c0_10] : memref<16x1xf32, #tpu.memory_space<vmem>>, vector<16x1xf32>
    %15 = vector.broadcast %14 : vector<16x1xf32> to vector<16x32xf32>
    %16 = arith.addf %13, %15 : vector<16x32xf32>
    %17 = math.tanh %16 : vector<16x32xf32>
    %18 = vector.extract_strided_slice %17 {offsets = [0, 0], sizes = [8, 32], strides = [1, 1]} : vector<16x32xf32> to vector<8x32xf32>
    %19 = vector.extract_strided_slice %17 {offsets = [8, 0], sizes = [8, 32], strides = [1, 1]} : vector<16x32xf32> to vector<8x32xf32>
    %20 = arith.addf %9, %19 : vector<8x32xf32>
    %21 = arith.subf %9, %19 : vector<8x32xf32>
    %22 = arith.mulf %18, %21 : vector<8x32xf32>
    %23 = arith.addf %20, %22 : vector<8x32xf32>
    %cst_11 = arith.constant 2.500000e-01 : f32
    %24 = vector.broadcast %cst_11 : f32 to vector<8x32xf32>
    %25 = arith.mulf %24, %23 : vector<8x32xf32>
    %26 = math.tanh %25 : vector<8x32xf32>
    %cst_12 = arith.constant 5.000000e-01 : f32
    %27 = vector.broadcast %cst_12 : f32 to vector<8x32xf32>
    %28 = arith.mulf %27, %26 : vector<8x32xf32>
    %cst_13 = arith.constant 5.000000e-01 : f32
    %29 = vector.broadcast %cst_13 : f32 to vector<8x32xf32>
    %30 = arith.addf %28, %29 : vector<8x32xf32>
    %c0_14 = arith.constant 0 : index
    %c0_15 = arith.constant 0 : index
    %31 = vector.load %arg6[%c0_14, %c0_15] : memref<8x32xf32, #tpu.memory_space<vmem>>, vector<8x32xf32>
    tpu.vector_store %arg6[%c0_14, %c0_15], %30 {strides = array<i32>} : memref<8x32xf32, #tpu.memory_space<vmem>>, vector<8x32xf32>,
    return
  }
  func.func @transform_0(%arg0: i32) -> (i32, i32) {
    %c0_i32 = arith.constant 0 : i32
    %c0_i32_0 = arith.constant 0 : i32
    return %arg0, %c0_i32 : i32, i32
  }
  func.func @transform_1(%arg0: i32) -> (i32, i32) {
    %c0_i32 = arith.constant 0 : i32
    %c0_i32_0 = arith.constant 0 : i32
    %c0_i32_1 = arith.constant 0 : i32
    return %c0_i32, %c0_i32_0 : i32, i32
  }
  func.func @transform_2(%arg0: i32) -> (i32, i32) {
    %c0_i32 = arith.constant 0 : i32
    %c0_i32_0 = arith.constant 0 : i32
    %c0_i32_1 = arith.constant 0 : i32
    return %c0_i32, %c0_i32_0 : i32, i32
  }
  func.func @transform_3(%arg0: i32) -> (i32, i32) {
    %c0_i32 = arith.constant 0 : i32
    %c0_i32_0 = arith.constant 0 : i32
    %c0_i32_1 = arith.constant 0 : i32
    return %c0_i32, %c0_i32_0 : i32, i32
  }
  func.func @transform_4(%arg0: i32) -> (i32, i32) {
    %c0_i32 = arith.constant 0 : i32
    %c0_i32_0 = arith.constant 0 : i32
    %c0_i32_1 = arith.constant 0 : i32
    return %c0_i32, %c0_i32_0 : i32, i32
  }
  func.func @transform_5(%arg0: i32) -> (i32, i32) {
    %c0_i32 = arith.constant 0 : i32
    %c0_i32_0 = arith.constant 0 : i32
    return %c0_i32, %arg0 : i32, i32
  }
}

</mosaic_0001>

<bundles_post_ra>
// kernel: tpu_custom_call.1
= control target key start
LH: loop header
LB: loop body
LE: loop exit
PB: predicated region body
PF: predicated region fallthrough
CT: control target
= control target key end

     0   :  { %vm60_vm0 = vcmask 130048   ;;  %v260_v2 = vmov 0   ;;  %s369_s0 = inlined_call_operand.vmem [shape: f32[32,16], index: 0, kind: input, shape index: {}]   ;;  %s370_s1 = inlined_call_operand.vmem [shape: f32[40,16], index: 1, kind: input, shape index: {}]   ;;  %s371_s2 = inlined_call_operand.vmem [shape: f32[40,1], index: 2, kind: input, shape index: {}]   ;;  %s372_s3 = inlined_call_operand.vmem [shape: f32[16,32], index: 3, kind: input, shape index: {}]   ;;  %s373_s4 = inlined_call_operand.vmem [shape: f32[16,1], index: 4, kind: input, shape index: {}]   ;;  %s374_s5 = inlined_call_operand.hbm [shape: f32[8,32], index: 5, kind: output, shape index: {}]  }
   0x1   :  { %v24_v0 = vld [vmem:[%s369_s0 + $0x18] sm:$0xff]  ;;  %v23_v1 = vld [vmem:[%s369_s0 + $0x10] sm:$0xff]  ;;  %217 = vset.pattern.permute.xlu0 %v260_v2  ;;  %v34_v3 = vld [vmem:[%s371_s2 + $0x20] sm:$0xff]  ;;  %218 = vset.pattern.permute.xlu1 %v260_v2 }
   0x2   :  { %207 = vmatpush.xpose.msk.msra.mxu2 %vm60_vm0, %v24_v0  ;;  %208 = vmatpush.xpose.msk.msra.mxu3 %vm60_vm0, %v24_v0  ;;  %v32_v4 = vld [vmem:[%s371_s2 + $0x10] sm:$0xff] }
   0x3   :  { %196 = vmatpush.xpose.msk.msra.mxu0 %vm60_vm0, %v24_v0  ;;  %57 = vperm.xlu0 %217, %v34_v3  }
   0x4   :  { %47 = vperm.xlu1 %218, %v32_v4   ;;  %219 = vset.pattern.permute.xlu2 %v260_v2 }
   0x5   :  { %10 = vsyncpa [#allocation3], 0  ;;  %v22_v5 = vld [vmem:[%s369_s0 + $0x8] sm:$0xff]  ;;  %v33_v6 = vld [vmem:[%s371_s2 + $0x18] sm:$0xff]  ;;  %vm139_vm1 = vcmask 261120   ;;  %s187_s28 = sshll.u32 %s374_s5, 4  ;;  %s188_s28 = int_to_ptr.hbm [resolvable:$true] %s187_s28 }
   0x6   :  { %209 = vmatpush.xpose.msk.msra.mxu2 %vm60_vm0, %v23_v1  ;;  %210 = vmatpush.xpose.msk.msra.mxu3 %vm60_vm0, %v23_v1  ;;  %v31_v7 = vld [vmem:[%s371_s2 + $0x8] sm:$0xff]  ;;  %v21_v8 = vld [vmem:[%s369_s0] sm:$0xff]  ;;  %v28_v10 = vld [vmem:[%s370_s1 + $0x18] sm:$0xff] }
   0x7   :  { %197 = vmatpush.xpose.msk.msra.mxu0 %vm60_vm0, %v23_v1  ;;  %v26_v9 = vld [vmem:[%s370_s1 + $0x8] sm:$0xff]  ;;  %v25_v11 = vld [vmem:[%s370_s1] sm:$0xff]  ;;  %v27_v13 = vld [vmem:[%s370_s1 + $0x10] sm:$0xff] }
   0x8   :  { %v30_v12 = vld [vmem:[%s371_s2] sm:$0xff]  ;;  %v128_v19 = vld [vmem:[%s373_s4 + $0x8] sm:$0xff] }
   0x9   :  { %v29_v14 = vld [vmem:[%s370_s1 + $0x20] sm:$0xff]  ;;  %136 = vperm.xlu2 %219, %v128_v19   ;;  %v126_v34 = vld [vmem:[%s372_s3 + $0x8] sm:$0xff] }
   0xa   :  { %211 = vmatpush.xpose.msk.msra.mxu2 %vm60_vm0, %v22_v5  ;;  %212 = vmatpush.xpose.msk.msra.mxu3 %vm60_vm0, %v22_v5  ;;  %v127_v21 = vld [vmem:[%s373_s4] sm:$0xff] }
   0xb   :  { %198 = vmatpush.xpose.msk.msra.mxu0 %vm60_vm0, %v22_v5  ;;  %52 = vperm.xlu0 %217, %v33_v6   ;;  %v125_v32 = vld [vmem:[%s372_s3] sm:$0xff]  ;;  %s261_s3 = smov [#allocation2]  }
   0xc   :  { %42 = vperm.xlu1 %218, %v31_v7   ;;  %s185_s25 = sshll.u32 %s261_s3, 4  ;;  %s186_s25 = int_to_ptr.vmem [resolvable:$true] %s185_s25 }
   0xe   :  { %213 = vmatpush.xpose.msk.msra.mxu2 %vm60_vm0, %v21_v8  ;;  %214 = vmatpush.xpose.msk.msra.mxu3 %vm60_vm0, %v21_v8 }
   0xf   :  { %199 = vmatpush.xpose.msk.msra.mxu0 %vm60_vm0, %v21_v8 }
  0x11   :  { %201 = vmatmul.msk.f32.vlgmr.msra.gmra.mxu2 %vm60_vm0, %v26_v9  ;;  %203 = vmatmul.msk.f32.vlgmr.msra.gmra.mxu3 %vm60_vm0, %v28_v10 }
  0x12   :  { %200 = vmatmul.msk.f32.vlgmr.msra.gmra.mxu0 %vm60_vm0, %v25_v11  ;;  %131 = vperm.xlu2 %219, %v127_v21  }
  0x13   :  { %37 = vperm.xlu0 %217, %v30_v12  }
  0x19   :  { %202 = vmatmul.msk.f32.gmra.mxu2 %vm60_vm0, %v27_v13  ;;  %204 = vmatmul.msk.f32.gmra.mxu3 %vm60_vm0, %v29_v14 }
  0x63   :  { %v137_v35 = vpop.permute.xlu2 %136 }
  0x6c   :  { %v132_v37 = vpop.permute.xlu2 %131 }
  0x75   :  { %v58_v15 = vpop.permute.xlu0 %57 }
  0x76   :  { %v48_v18 = vpop.permute.xlu1 %47 }
  0x7d   :  { %v53_v22 = vpop.permute.xlu0 %52 }
  0x7e   :  { %v43_v26 = vpop.permute.xlu1 %42 }
  0x85   :  { %v38_v39 = vpop.permute.xlu0 %37 }
  0x8f   :  { %v105_v40 = vpop.f32.mrf.mxu0 }
  0x90   :  { %v106_v43 = vadd.f32 %v105_v40, %v38_v39 }
  0x92   :  { %v120_v44 = vmax.f32 %v106_v43, 0.0 }
  0x94   :  { %v108_v16 = vpop.f32.mrf.mxu2  ;;  %v114_v17 = vpop.f32.mrf.mxu3 }
  0x95   :  { %v115_v25 = vadd.f32 %v114_v17, %v53_v22  ;;  %v109_v28 = vadd.f32 %v108_v16, %v43_v26 }
  0x9c   :  { %v117_v20 = vpop.f32.mrf.mxu3  ;;  %v111_v23 = vpop.f32.mrf.mxu2 }
  0x9d   :  { %v118_v24 = vadd.f32 %v117_v20, %v58_v15  ;;  %v112_v27 = vadd.f32 %v111_v23, %v48_v18 }
  0x9f   :  { %220 = vtanh.f32 %v118_v24 }
  0xa0   :  { %222 = vtanh.f32 %v115_v25 }
  0xa1   :  { %224 = vtanh.f32 %v112_v27 }
  0xa2   :  { %226 = vtanh.f32 %v109_v28 }
  0xa5   :  { %v221_v29 = vpop.eup %220 }
  0xa6   :  { %158 = vmatpush.msra.mxu1 %v221_v29  ;;  %v223_v30 = vpop.eup %222 }
  0xa7   :  { %v225_v31 = vpop.eup %224 }
  0xa8   :  { %159 = vmatpush.msra.mxu1 %v223_v30  ;;  %v227_v33 = vpop.eup %226 }
  0xaa   :  { %160 = vmatpush.msra.mxu1 %v225_v31 }
  0xac   :  { %161 = vmatpush.msra.mxu1 %v227_v33 }
  0xad   :  { %205 = vmatmul.msk.f32.vlgmr.msra.gmra.mxu1 %vm139_vm1, %v125_v32 }
  0xb5   :  { %206 = vmatmul.msk.f32.gmra.mxu1 %vm139_vm1, %v126_v34 }
 0x12a   :  { %v163_v36 = vpop.f32.mrf.mxu1 }
 0x12b   :  { %v164_v41 = vadd.f32 %v163_v36, %v132_v37 }
 0x132   :  { %v166_v38 = vpop.f32.mrf.mxu1 }
 0x133   :  { %v167_v42 = vadd.f32 %v166_v38, %v137_v35 }
 0x135   :  { %228 = vtanh.f32 %v167_v42 }
 0x136   :  { %230 = vtanh.f32 %v164_v41 }
 0x13b   :  { %v229_v45 = vpop.eup %228 }
 0x13c   :  { %v172_v46 = vsub.f32 %v120_v44, %v229_v45  ;;  %v231_v47 = vpop.eup %230  ;;  %v171_v48 = vadd.f32 %v229_v45, %v120_v44 }
 0x13e   :  { %v173_v49 = vmul.f32 %v231_v47, %v172_v46 }
 0x140   :  { %v174_v50 = vadd.f32 %v173_v49, %v171_v48 }
 0x142   :  { %v175_v51 = vmul.f32 0.25, %v174_v50 }
 0x144   :  { %232 = vtanh.f32 %v175_v51 }
 0x14a   :  { %v233_v52 = vpop.eup %232 }
 0x14b   :  { %v177_v53 = vmul.f32 0.5, %v233_v52 }
 0x14d   :  { %v178_v54 = vadd.f32 0.5, %v177_v53 }
 0x14f   :  { %179 = vst.msk [vmem:[#allocation2] sm:$0xff] %vm139_vm1, %v178_v54 }
 0x150   :  { %190 = dma.vmem_to_hbm [thread:$0]  %s186_s25, 128, %s188_s28, [#allocation3]  }
 0x151   :  { %258 = dma.done.wait [#allocation3], 128  }
 0x152   :  { %259 = vsyncadd [#allocation3], 4294967168 }
 0x153   :  { %195 = vsyncpa [#allocation3], 1 }

</bundles_post_ra>
